<compile_context>
chip_gen: v7x
topology: tpu7x:2x2x1
jax: 0.10.0
libtpu: 0.0.40
codegen_flags: <defaults>
</compile_context>

<pallas_src>
import functools

import jax
import jax.numpy as jnp
from jax.experimental import pallas as pl
from jax.experimental.pallas import tpu as pltpu


def _triplet_loss_kernel(a_ref, p_ref, n_ref, out_ref, acc_ref, *,
                         margin, batch, block_batch):
    j = pl.program_id(0)

    @pl.when(j == 0)
    def _init():
        acc_ref[...] = jnp.zeros_like(acc_ref)

    a = a_ref[...].astype(jnp.float32)
    p = p_ref[...].astype(jnp.float32)
    n = n_ref[...].astype(jnp.float32)

    # Five row reductions (reduce-then-rescale) instead of three full
    # block_batch x D l2-normalizations.  NOTE: verify in the bundle dump that
    # Mosaic fuses these into one pass over the VMEM tiles.
    ssq_a = jnp.sum(a * a, axis=1, keepdims=True)
    ssq_p = jnp.sum(p * p, axis=1, keepdims=True)
    ssq_n = jnp.sum(n * n, axis=1, keepdims=True)
    dot_ap = jnp.sum(a * p, axis=1, keepdims=True)
    dot_an = jnp.sum(a * n, axis=1, keepdims=True)

    # 1 / max(||x||, eps) == rsqrt(max(||x||^2, eps^2)); eps = 1e-12 matches
    # torch.nn.functional.normalize.  rsqrt runs on the (otherwise idle) EUP.
    eps2 = jnp.float32(1e-24)
    inv_a = jax.lax.rsqrt(jnp.maximum(ssq_a, eps2))
    inv_p = jax.lax.rsqrt(jnp.maximum(ssq_p, eps2))
    inv_n = jax.lax.rsqrt(jnp.maximum(ssq_n, eps2))

    cos_ap = dot_ap * inv_a * inv_p
    cos_an = dot_an * inv_a * inv_n

    # (1 - cos_ap) - (1 - cos_an) == cos_an - cos_ap
    loss = jnp.maximum(jnp.float32(margin) + cos_an - cos_ap, jnp.float32(0.0))

    # Mask rows beyond the true batch (partial last block).  Must happen
    # BEFORE accumulation: padding rows may hold NaN/Inf garbage.
    row = j * block_batch + jax.lax.broadcasted_iota(jnp.int32, loss.shape, 0)
    loss = jnp.where(row < batch, loss, jnp.float32(0.0))

    # Elementwise accumulation: no per-step cross-sublane reduce, no scalar RMW.
    acc_ref[...] += loss

    @pl.when(j == pl.num_programs(0) - 1)
    def _finalize():
        # Single full reduction + mean + output write, outside the hot loop.
        mean = jnp.sum(acc_ref[...]) * jnp.float32(1.0 / batch)
        out_ref[...] = jnp.reshape(mean, (1, 1))


def triplet_loss(anchor, positive, negative, *, margin=0.3, block_batch=None):
    """Cosine triplet loss with 'mean' reduction, computed in one Pallas kernel."""
    assert anchor.shape == positive.shape == negative.shape
    assert anchor.ndim == 2
    B, D = anchor.shape
    itemsize = jnp.dtype(anchor.dtype).itemsize

    # dtype-aware sublane granule: 8 rows (f32), 16 (bf16), 32 (int8/fp8).
    granule = max(8, 32 // itemsize)
    # VMEM footprint of one input row (last dim pads to a multiple of 128 lanes).
    vmem_row_bytes = ((D + 127) // 128) * 128 * itemsize

    # Per-generation VMEM budget for the double-buffered input pipeline.
    # v7x has 64 MiB physical VMEM; v5e/v6e have 128 MiB.
    try:
        vmem_cap = int(pltpu.get_tpu_info().vmem_capacity_bytes)
    except Exception:
        vmem_cap = 64 * 1024 * 1024  # conservative fallback (v7x physical)
    input_budget = min(vmem_cap // 2, 48 * 1024 * 1024)

    if block_batch is None:
        # 3 inputs x 2 pipeline buffers per row + the (rows, 1) f32 accumulator
        # (lane-padded to 128).
        per_row_bytes = 3 * 2 * vmem_row_bytes + 128 * 4
        cap_rows = max(granule, input_budget // per_row_bytes)
        if B <= cap_rows:
            block_batch = B  # single block; "equal full dim" is always legal
        else:
            block_batch = max(granule, (cap_rows // granule) * granule)

    num_blocks = pl.cdiv(B, block_batch)
    vmem_limit = int(min(vmem_cap, input_budget + 16 * 1024 * 1024))

    kernel = functools.partial(
        _triplet_loss_kernel, margin=float(margin), batch=B,
        block_batch=block_batch)

    cost = pl.CostEstimate(
        flops=10 * B * D,
        transcendentals=3 * B,
        bytes_accessed=3 * B * D * itemsize + 4,
    )

    out = pl.pallas_call(
        kernel,
        out_shape=jax.ShapeDtypeStruct((1, 1), jnp.float32),
        grid_spec=pltpu.PrefetchScalarGridSpec(
            num_scalar_prefetch=0,
            grid=(num_blocks,),
            in_specs=[pl.BlockSpec((block_batch, D), lambda j: (j, 0))] * 3,
            out_specs=pl.BlockSpec((1, 1), lambda j: (0, 0)),
            scratch_shapes=[pltpu.VMEM((block_batch, 1), jnp.float32)],
        ),
        compiler_params=pltpu.CompilerParams(
            dimension_semantics=("arbitrary",),
            vmem_limit_bytes=vmem_limit,
        ),
        cost_estimate=cost,
    )(anchor, positive, negative)

    return out[0, 0]


if __name__ == "__main__":
    key = jax.random.PRNGKey(0)
    k_a, k_p, k_n = jax.random.split(key, 3)

    def ref(a, p, n, margin=0.3):
        a = a.astype(jnp.float32)
        p = p.astype(jnp.float32)
        n = n.astype(jnp.float32)

        def norm(x):
            return x / jnp.maximum(
                jnp.sqrt(jnp.sum(x * x, axis=1, keepdims=True)), 1e-12)

        a, p, n = norm(a), norm(p), norm(n)
        pos = 1.0 - jnp.sum(a * p, axis=1)
        neg = 1.0 - jnp.sum(a * n, axis=1)
        return jnp.mean(jnp.maximum(margin + pos - neg, 0.0))

    # 1) Small demo shape (batch=8, embedding_dim=32): single block, no mask.
    B, D = 8, 32
    a = jax.random.normal(k_a, (B, D), dtype=jnp.float32)
    p = jax.random.normal(k_p, (B, D), dtype=jnp.float32)
    n = jax.random.normal(k_n, (B, D), dtype=jnp.float32)
    loss = triplet_loss(a, p, n, margin=0.3)
    jax.block_until_ready(loss)
    expected = ref(a, p, n)
    assert jnp.allclose(loss, expected, atol=1e-5, rtol=1e-5), (loss, expected)

    # 2) Tiled path with a partial (masked) last block.
    B2, D2 = 100, 256
    a2 = jax.random.normal(k_a, (B2, D2), dtype=jnp.float32)
    p2 = jax.random.normal(k_p, (B2, D2), dtype=jnp.float32)
    n2 = jax.random.normal(k_n, (B2, D2), dtype=jnp.float32)
    loss2 = triplet_loss(a2, p2, n2, margin=0.3, block_batch=16)
    jax.block_until_ready(loss2)
    expected2 = ref(a2, p2, n2)
    assert jnp.allclose(loss2, expected2, atol=1e-5, rtol=1e-5), (loss2, expected2)

    # 3) bf16 inputs: dtype-aware granule/budget, f32 accumulation in-kernel.
    B3, D3 = 64, 32
    a3 = jax.random.normal(k_a, (B3, D3), dtype=jnp.bfloat16)
    p3 = jax.random.normal(k_p, (B3, D3), dtype=jnp.bfloat16)
    n3 = jax.random.normal(k_n, (B3, D3), dtype=jnp.bfloat16)
    loss3 = triplet_loss(a3, p3, n3, margin=0.3, block_batch=32)
    jax.block_until_ready(loss3)
    expected3 = ref(a3, p3, n3)
    assert jnp.allclose(loss3, expected3, atol=1e-2, rtol=1e-2), (loss3, expected3)

    print("KERNEL_OK")
</pallas_src>

<mosaic_0001>
module attributes {stable_mosaic.version = 11 : i64} {
  func.func @_triplet_loss_kernel(%arg0: i32, %arg1: memref<8x32xf32, #tpu.memory_space<vmem>>, %arg2: memref<8x32xf32, #tpu.memory_space<vmem>>, %arg3: memref<8x32xf32, #tpu.memory_space<vmem>>, %arg4: memref<1x1xf32, #tpu.memory_space<vmem>>, %arg5: memref<8x1xf32, #tpu.memory_space<vmem>>) attributes {dimension_semantics = [#tpu.dimension_semantics<arbitrary>], iteration_bounds = array<i64: 1>, scalar_prefetch = 0 : i64, scratch_operands = 1 : i64, tpu.core_type = #tpu.core_type<tc>, window_params = [{transform_indices = @transform_0, window_bounds = array<i64: 8, 32>}, {transform_indices = @transform_1, window_bounds = array<i64: 8, 32>}, {transform_indices = @transform_2, window_bounds = array<i64: 8, 32>}, {pipeline_mode = #tpu.pipeline_mode<synchronous>, transform_indices = @transform_3, window_bounds = array<i64: 1, 1>}]} {
    %c0_i32 = arith.constant 0 : i32
    %0 = arith.cmpi eq, %arg0, %c0_i32 : i32
    %1 = arith.extui %0 : i1 to i32
    %c0_i32_0 = arith.constant 0 : i32
    %2 = arith.cmpi ne, %1, %c0_i32_0 : i32
    scf.if %2 {
      %cst_23 = arith.constant 0.000000e+00 : f32
      %53 = vector.broadcast %cst_23 : f32 to vector<8x1xf32>
      %c0_24 = arith.constant 0 : index
      %c0_25 = arith.constant 0 : index
      %54 = vector.load %arg5[%c0_24, %c0_25] : memref<8x1xf32, #tpu.memory_space<vmem>>, vector<8x1xf32>
      tpu.vector_store %arg5[%c0_24, %c0_25], %53 {strides = array<i32>} : memref<8x1xf32, #tpu.memory_space<vmem>>, vector<8x1xf32>,
    } else {
    }
    %c0 = arith.constant 0 : index
    %c0_1 = arith.constant 0 : index
    %3 = vector.load %arg1[%c0, %c0_1] : memref<8x32xf32, #tpu.memory_space<vmem>>, vector<8x32xf32>
    %c0_2 = arith.constant 0 : index
    %c0_3 = arith.constant 0 : index
    %4 = vector.load %arg2[%c0_2, %c0_3] : memref<8x32xf32, #tpu.memory_space<vmem>>, vector<8x32xf32>
    %c0_4 = arith.constant 0 : index
    %c0_5 = arith.constant 0 : index
    %5 = vector.load %arg3[%c0_4, %c0_5] : memref<8x32xf32, #tpu.memory_space<vmem>>, vector<8x32xf32>
    %6 = arith.mulf %3, %3 : vector<8x32xf32>
    %cst = arith.constant dense<0.000000e+00> : vector<8xf32>
    %7 = vector.multi_reduction <add>, %6, %cst [1] : vector<8x32xf32> to vector<8xf32>
    %8 = vector.shape_cast %7 : vector<8xf32> to vector<8x1xf32>
    %9 = arith.mulf %4, %4 : vector<8x32xf32>
    %cst_6 = arith.constant dense<0.000000e+00> : vector<8xf32>
    %10 = vector.multi_reduction <add>, %9, %cst_6 [1] : vector<8x32xf32> to vector<8xf32>
    %11 = vector.shape_cast %10 : vector<8xf32> to vector<8x1xf32>
    %12 = arith.mulf %5, %5 : vector<8x32xf32>
    %cst_7 = arith.constant dense<0.000000e+00> : vector<8xf32>
    %13 = vector.multi_reduction <add>, %12, %cst_7 [1] : vector<8x32xf32> to vector<8xf32>
    %14 = vector.shape_cast %13 : vector<8xf32> to vector<8x1xf32>
    %15 = arith.mulf %3, %4 : vector<8x32xf32>
    %cst_8 = arith.constant dense<0.000000e+00> : vector<8xf32>
    %16 = vector.multi_reduction <add>, %15, %cst_8 [1] : vector<8x32xf32> to vector<8xf32>
    %17 = vector.shape_cast %16 : vector<8xf32> to vector<8x1xf32>
    %18 = arith.mulf %3, %5 : vector<8x32xf32>
    %cst_9 = arith.constant dense<0.000000e+00> : vector<8xf32>
    %19 = vector.multi_reduction <add>, %18, %cst_9 [1] : vector<8x32xf32> to vector<8xf32>
    %20 = vector.shape_cast %19 : vector<8xf32> to vector<8x1xf32>
    %cst_10 = arith.constant 1.000000e-24 : f32
    %21 = vector.broadcast %cst_10 : f32 to vector<8x1xf32>
    %22 = arith.maximumf %8, %21 : vector<8x1xf32>
    %23 = math.rsqrt %22 : vector<8x1xf32>
    %cst_11 = arith.constant 1.000000e-24 : f32
    %24 = vector.broadcast %cst_11 : f32 to vector<8x1xf32>
    %25 = arith.maximumf %11, %24 : vector<8x1xf32>
    %26 = math.rsqrt %25 : vector<8x1xf32>
    %cst_12 = arith.constant 1.000000e-24 : f32
    %27 = vector.broadcast %cst_12 : f32 to vector<8x1xf32>
    %28 = arith.maximumf %14, %27 : vector<8x1xf32>
    %29 = math.rsqrt %28 : vector<8x1xf32>
    %30 = arith.mulf %17, %23 : vector<8x1xf32>
    %31 = arith.mulf %30, %26 : vector<8x1xf32>
    %32 = arith.mulf %20, %23 : vector<8x1xf32>
    %33 = arith.mulf %32, %29 : vector<8x1xf32>
    %cst_13 = arith.constant 3.000000e-01 : f32
    %34 = vector.broadcast %cst_13 : f32 to vector<8x1xf32>
    %35 = arith.addf %34, %33 : vector<8x1xf32>
    %36 = arith.subf %35, %31 : vector<8x1xf32>
    %cst_14 = arith.constant 0.000000e+00 : f32
    %37 = vector.broadcast %cst_14 : f32 to vector<8x1xf32>
    %38 = arith.maximumf %36, %37 : vector<8x1xf32>
    %c8_i32 = arith.constant 8 : i32
    %39 = arith.muli %arg0, %c8_i32 : i32
    %40 = tpu.iota {dimensions = array<i32: 0>} : vector<8x1xi32>
    %41 = vector.broadcast %39 : i32 to vector<8x1xi32>
    %42 = arith.addi %41, %40 : vector<8x1xi32>
    %c8_i32_15 = arith.constant 8 : i32
    %43 = vector.broadcast %c8_i32_15 : i32 to vector<8x1xi32>
    %44 = arith.cmpi slt, %42, %43 : vector<8x1xi32>
    %cst_16 = arith.constant 0.000000e+00 : f32
    %45 = vector.broadcast %cst_16 : f32 to vector<8x1xf32>
    %46 = arith.select %44, %38, %45 : vector<8x1xi1>, vector<8x1xf32>
    %c0_17 = arith.constant 0 : index
    %c0_18 = arith.constant 0 : index
    %47 = vector.load %arg5[%c0_17, %c0_18] : memref<8x1xf32, #tpu.memory_space<vmem>>, vector<8x1xf32>
    %48 = arith.addf %47, %46 : vector<8x1xf32>
    %c0_19 = arith.constant 0 : index
    %c0_20 = arith.constant 0 : index
    %49 = vector.load %arg5[%c0_19, %c0_20] : memref<8x1xf32, #tpu.memory_space<vmem>>, vector<8x1xf32>
    tpu.vector_store %arg5[%c0_19, %c0_20], %48 {strides = array<i32>} : memref<8x1xf32, #tpu.memory_space<vmem>>, vector<8x1xf32>,
    %c0_i32_21 = arith.constant 0 : i32
    %50 = arith.cmpi eq, %arg0, %c0_i32_21 : i32
    %51 = arith.extui %50 : i1 to i32
    %c0_i32_22 = arith.constant 0 : i32
    %52 = arith.cmpi ne, %51, %c0_i32_22 : i32
    scf.if %52 {
      %c0_23 = arith.constant 0 : index
      %c0_24 = arith.constant 0 : index
      %53 = vector.load %arg5[%c0_23, %c0_24] : memref<8x1xf32, #tpu.memory_space<vmem>>, vector<8x1xf32>
      %54 = vector.shape_cast %53 : vector<8x1xf32> to vector<1x8x1xf32>
      %cst_25 = arith.constant dense<0.000000e+00> : vector<1xf32>
      %55 = vector.multi_reduction <add>, %54, %cst_25 [1, 2] : vector<1x8x1xf32> to vector<1xf32>
      %56 = vector.shape_cast %55 : vector<1xf32> to vector<1x1x1xf32>
      %57 = vector.extract %56[0, 0, 0] : f32 from vector<1x1x1xf32>
      %cst_26 = arith.constant 1.250000e-01 : f32
      %58 = arith.mulf %57, %cst_26 : f32
      %59 = vector.broadcast %58 : f32 to vector<1x1xf32>
      %c0_27 = arith.constant 0 : index
      %c0_28 = arith.constant 0 : index
      %60 = vector.load %arg4[%c0_27, %c0_28] : memref<1x1xf32, #tpu.memory_space<vmem>>, vector<1x1xf32>
      tpu.vector_store %arg4[%c0_27, %c0_28], %59 {strides = array<i32>} : memref<1x1xf32, #tpu.memory_space<vmem>>, vector<1x1xf32>,
    } else {
    }
    return
  }
  func.func @transform_0(%arg0: i32) -> (i32, i32) {
    %c0_i32 = arith.constant 0 : i32
    %c0_i32_0 = arith.constant 0 : i32
    return %arg0, %c0_i32 : i32, i32
  }
  func.func @transform_1(%arg0: i32) -> (i32, i32) {
    %c0_i32 = arith.constant 0 : i32
    %c0_i32_0 = arith.constant 0 : i32
    return %arg0, %c0_i32 : i32, i32
  }
  func.func @transform_2(%arg0: i32) -> (i32, i32) {
    %c0_i32 = arith.constant 0 : i32
    %c0_i32_0 = arith.constant 0 : i32
    return %arg0, %c0_i32 : i32, i32
  }
  func.func @transform_3(%arg0: i32) -> (i32, i32) {
    %c0_i32 = arith.constant 0 : i32
    %c0_i32_0 = arith.constant 0 : i32
    %c0_i32_1 = arith.constant 0 : i32
    return %c0_i32, %c0_i32_0 : i32, i32
  }
}

</mosaic_0001>

<bundles_post_ra>
// kernel: tpu_custom_call.1
= control target key start
LH: loop header
LB: loop body
LE: loop exit
PB: predicated region body
PF: predicated region fallthrough
CT: control target
= control target key end

     0   :  { %8 = vsyncpa [#allocation4], 0  ;;  %s326_s0 = inlined_call_operand.hbm [shape: f32[8,32], index: 0, kind: input, shape index: {}]   ;;  %s327_s1 = inlined_call_operand.hbm [shape: f32[8,32], index: 1, kind: input, shape index: {}]   ;;  %s328_s2 = inlined_call_operand.hbm [shape: f32[8,32], index: 2, kind: input, shape index: {}]   ;;  %s329_s3 = inlined_call_operand.hbm [shape: f32[1,1], index: 3, kind: output, shape index: {}]  }
   0x1   :  { %9 = vsyncpa [#allocation7], 0 }
   0x2   :  { %10 = vsyncpa [#allocation5], 0  ;;  %s245_s12 = smov [#allocation6]   ;;  %s246_s14 = smov [#allocation3]  }
   0x3   :  { %s27_s13 = sshll.u32 %s245_s12, 4  ;;  %s17_s15 = sshll.u32 %s246_s14, 4  ;;  %s28_s13 = int_to_ptr.vmem [resolvable:$true] %s27_s13  ;;  %s18_s15 = int_to_ptr.vmem [resolvable:$true] %s17_s15 }
   0x4   :  { %s151_s18 = scalar_lea.hbm %s327_s1, 128 }
   0x5   :  { %p152_p0 = scmp.ne.s32.totalorder %s327_s1, %s151_s18  ;;  %p155_p1 = scmp.lt.u32.totalorder %s151_s18, %s327_s1 }
   0x7   :  { %p157_p2 = pnand %p155_p1, %p152_p0 }
   0x9   :  { %160 = shalt.err (!%p157_p2)
}
   0xa   :  { %s161_s23 = scalar_lea.vmem %s28_s13, 128  ;;  %p166_p4 = scmp.lt.s32.totalorder %s28_s13, %s28_s13 }
   0xb   :  { %p162_p3 = scmp.ne.s32.totalorder %s28_s13, %s161_s23  ;;  %p167_p5 = scmp.lt.s32.totalorder %s161_s23, %s161_s23 }
   0xd   :  { %p168_p6 = por %p167_p5, %p166_p4 }
   0xf   :  { %p169_p7 = pnand %p168_p6, %p162_p3 }
  0x11   :  { %172 = shalt.err (!%p169_p7)
}
  0x12   :  { %30 = dma.hbm_to_vmem [thread:$0]  %s327_s1, 128, %s28_s13, [#allocation7]  }
  0x13   :  { %s173_s28 = scalar_lea.hbm %s326_s0, 128 }
  0x14   :  { %p174_p8 = scmp.ne.s32.totalorder %s326_s0, %s173_s28  ;;  %p177_p9 = scmp.lt.u32.totalorder %s173_s28, %s326_s0 }
  0x16   :  { %p179_p10 = pnand %p177_p9, %p174_p8 }
  0x18   :  { %182 = shalt.err (!%p179_p10)
}
  0x19   :  { %s183_s6 = scalar_lea.vmem %s18_s15, 128  ;;  %p188_p12 = scmp.lt.s32.totalorder %s18_s15, %s18_s15 }
  0x1a   :  { %p184_p11 = scmp.ne.s32.totalorder %s18_s15, %s183_s6  ;;  %p189_p13 = scmp.lt.s32.totalorder %s183_s6, %s183_s6 }
  0x1c   :  { %p190_p0 = por %p189_p13, %p188_p12 }
  0x1e   :  { %p191_p1 = pnand %p190_p0, %p184_p11 }
  0x20   :  { %194 = shalt.err (!%p191_p1)
}
  0x21   :  { %20 = dma.hbm_to_vmem [thread:$0]  %s326_s0, 128, %s18_s15, [#allocation4]  }
  0x22   :  { %s247_s8 = smov [#allocation8]   ;;  %s195_s12 = scalar_lea.hbm %s328_s2, 128 }
  0x23   :  { %s37_s9 = sshll.u32 %s247_s8, 4  ;;  %p196_p2 = scmp.ne.s32.totalorder %s328_s2, %s195_s12  ;;  %s38_s9 = int_to_ptr.vmem [resolvable:$true] %s37_s9 }
  0x24   :  { %p199_p3 = scmp.lt.u32.totalorder %s195_s12, %s328_s2 }
  0x26   :  { %p201_p4 = pnand %p199_p3, %p196_p2 }
  0x28   :  { %204 = shalt.err (!%p201_p4)
}
  0x29   :  { %s205_s18 = scalar_lea.vmem %s38_s9, 128  ;;  %p210_p6 = scmp.lt.s32.totalorder %s38_s9, %s38_s9 }
  0x2a   :  { %p206_p5 = scmp.ne.s32.totalorder %s38_s9, %s205_s18  ;;  %p211_p7 = scmp.lt.s32.totalorder %s205_s18, %s205_s18 }
  0x2c   :  { %p212_p8 = por %p211_p7, %p210_p6 }
  0x2e   :  { %p213_p9 = pnand %p212_p8, %p206_p5 }
  0x30   :  { %216 = shalt.err (!%p213_p9)
}
  0x31   :  { %40 = dma.hbm_to_vmem [thread:$0]  %s328_s2, 128, %s38_s9, [#allocation7]  }
  0x32   :  { %239 = dma.done.wait [#allocation4], 128  }
  0x33   :  { %240 = vsyncadd [#allocation4], 4294967168 }
  0x34   :  { %241 = dma.done.wait [#allocation7], 256  }
  0x35   :  { %242 = vsyncadd [#allocation7], 4294967040  ;;  %v56_v0 = vld [vmem:[#allocation3] sm:$0xff]  ;;  %vm60_vm0 = vcmask 261120   ;;  %v57_v1 = vld [vmem:[#allocation6] sm:$0xff]  ;;  %vm54_vm1 = vcmask 7168  }
  0x36   :  { %v58_v2 = vld [vmem:[#allocation8] sm:$0xff]  ;;  %v59_v3 = vmul.f32 %v56_v0, %v56_v0  ;;  %v64_v4 = vmul.f32 %v57_v1, %v57_v1  ;;  %v72_v11 = vmul.f32 %v57_v1, %v56_v0  ;;  %v248_v13 = vmov 0.0   ;;  %s249_s2 = smov [#allocation9]  }
  0x37   :  { %v68_v5 = vmul.f32 %v58_v2, %v58_v2  ;;  %v76_v6 = vmul.f32 %v58_v2, %v56_v0  ;;  %55 = vst.msk [vmem:[#allocation2] sm:$0xff] %vm54_vm1, %v248_v13  ;;  %s128_s19 = sshll.u32 %s249_s2, 4  ;;  %vm120_vm2 = vcmask 0   ;;  %s129_s19 = int_to_ptr.vmem [resolvable:$true] %s128_s19 }
  0x38   :  { %v61_v7 = vsel %vm60_vm0, %v59_v3, 0.0  ;;  %v65_v8 = vsel %vm60_vm0, %v64_v4, 0.0  ;;  %v73_v12 = vsel %vm60_vm0, %v72_v11, 0.0  ;;  %s217_s22 = scalar_lea.vmem %s129_s19, 16  ;;  %s221_s23 = scalar_lea.vmem %s129_s19, 32 }
  0x39   :  { %62 = vadd.xlane.f32.xlu0 %v61_v7  ;;  %66 = vadd.xlane.f32.xlu1 %v65_v8  ;;  %v69_v9 = vsel %vm60_vm0, %v68_v5, 0.0  ;;  %v77_v10 = vsel %vm60_vm0, %v76_v6, 0.0  ;;  %p218_p10 = scmp.ne.s32.totalorder %s129_s19, %s217_s22  ;;  %p222_p11 = scmp.lt.s32.totalorder %s129_s19, %s129_s19 }
  0x3a   :  { %p223_p12 = scmp.lt.s32.totalorder %s221_s23, %s217_s22 }
  0x3c   :  { %p224_p13 = por %p223_p12, %p222_p11 }
  0x3d   :  { %70 = vadd.xlane.f32.xlu0 %v69_v9  ;;  %78 = vadd.xlane.f32.xlu1 %v77_v10 }
  0x3e   :  { %v100_v31 = vld [vmem:[#allocation2] sm:$0xff]  ;;  %p225_p0 = pnand %p224_p13, %p218_p10 }
  0x41   :  { %74 = vadd.xlane.f32.xlu0 %v73_v12 }
  0xc6   :  { %v63_v14 = vpop.xlane.xlu0 %62  ;;  %v67_v15 = vpop.xlane.xlu1 %66 }
  0xc7   :  { %v80_v16 = vmax.f32 %v63_v14, 1e-24  ;;  %v82_v17 = vmax.f32 %v67_v15, 1e-24 }
  0xc9   :  { %145 = vrsqrt.f32 %v80_v16 }
  0xca   :  { %v71_v18 = vpop.xlane.xlu0 %70  ;;  %147 = vrsqrt.f32 %v82_v17  ;;  %v79_v21 = vpop.xlane.xlu1 %78 }
  0xcb   :  { %v84_v19 = vmax.f32 %v71_v18, 1e-24 }
  0xcd   :  { %149 = vrsqrt.f32 %v84_v19 }
  0xce   :  { %v75_v22 = vpop.xlane.xlu0 %74 }
  0xd3   :  { %v146_v20 = vpop.eup %145 }
  0xd4   :  { %v148_v23 = vpop.eup %147  ;;  %v88_v24 = vmul.f32 %v146_v20, %v79_v21  ;;  %v86_v25 = vmul.f32 %v146_v20, %v75_v22 }
  0xd6   :  { %v87_v29 = vmul.f32 %v148_v23, %v86_v25 }
  0xd7   :  { %v150_v26 = vpop.eup %149 }
  0xd8   :  { %v89_v27 = vmul.f32 %v150_v26, %v88_v24 }
  0xda   :  { %v90_v28 = vadd.f32 0.3, %v89_v27 }
  0xdc   :  { %v91_v30 = vsub.f32 %v90_v28, %v87_v29 }
  0xde   :  { %v92_v32 = vmax.f32 %v91_v30, 0.0 }
  0xe0   :  { %v101_v33 = vadd.f32 %v100_v31, %v92_v32 }
  0xe2   :  { %103 = vst.msk [vmem:[#allocation2] sm:$0xff] %vm54_vm1, %v101_v33 }
  0xe9   :  { %v107_v34 = vld [vmem:[#allocation2] sm:$0xff] }
  0xea   :  { %v108_v35 = vsel %vm54_vm1, %v107_v34, 0.0 }
  0xeb   :  { %109 = vadd.xlane.f32.xlu1 %v108_v35 }
 0x178   :  { %v110_v36 = vpop.xlane.xlu1 %109 }
 0x179   :  { %v111_v37 = vrot.slane %v110_v36, 4 }
 0x17b   :  { %v112_v38 = vadd.f32 %v111_v37, %v110_v36 }
 0x17d   :  { %v113_v39 = vrot.slane %v112_v38, 2 }
 0x17f   :  { %v114_v40 = vadd.f32 %v113_v39, %v112_v38 }
 0x181   :  { %v115_v41 = vrot.slane %v114_v40, 1 }
 0x183   :  { %v116_v42 = vadd.f32 %v115_v41, %v114_v40 }
 0x185   :  { %138 = vpush %v116_v42 }
 0x1b6   :  { %s139_s20 = spop %138 }
 0x1b7   :  { %s118_s21 = smul.f32 0.125, %s139_s20 }
 0x1b9   :  { %v119_v43 = vstv %s118_s21 }
 0x1ba   :  { %121 = vst.msk [vmem:[#allocation9] sm:$0x1] %vm120_vm2, %v119_v43 }
 0x1bb   :  { %228 = shalt.err (!%p225_p0)
}
 0x1bc   :  { %s229_s26 = scalar_lea.hbm %s329_s3, 16 }
 0x1bd   :  { %p230_p1 = scmp.ne.s32.totalorder %s329_s3, %s229_s26  ;;  %p233_p2 = scmp.lt.u32.totalorder %s229_s26, %s329_s3 }
 0x1bf   :  { %p235_p3 = pnand %p233_p2, %p230_p1 }
 0x1c1   :  { %238 = shalt.err (!%p235_p3)
}
 0x1c2   :  { %131 = dma.vmem_to_hbm [thread:$0]  %s129_s19, 16, %s329_s3, [#allocation5]  }
 0x1c3   :  { %243 = dma.done.wait [#allocation5], 16  }
 0x1c4   :  { %244 = vsyncadd [#allocation5], 4294967280 }
 0x1c5   :  { %135 = vsyncpa [#allocation4], 1 }
 0x1c6   :  { %136 = vsyncpa [#allocation7], 1 }
 0x1c7   :  { %137 = vsyncpa [#allocation5], 1 }

</bundles_post_ra>
